<compile_context>
chip_gen: v6e
topology: v6e:2x2x1
jax: 0.10.0
libtpu: 0.0.40
codegen_flags: <defaults>
</compile_context>

<pallas_src>
import jax
import jax.numpy as jnp
from jax.experimental import pallas as pl
from jax.experimental.pallas import tpu as pltpu


def _round_up(x, m):
    return ((x + m - 1) // m) * m


def random_policy_kernel(r_ref, out_ref):
    # r_ref:   (block_b, 1)     int32   - sampled action index per row.
    # out_ref: (block_b, A_pad) float32 - lane-dense one-hot rows (eye(A)[r]).
    idx = jax.lax.broadcasted_iota(jnp.int32, out_ref.shape, 1)
    out_ref[...] = (idx == r_ref[...]).astype(out_ref.dtype)


def random_policy_sample(key, action_space, batch=1, *, block_rows=512):
    """Draw `batch` random one-hot actions. Returns (batch, action_space) f32."""
    a_pad = _round_up(max(action_space, 1), 128)   # lane-dense output width
    b_pad = _round_up(max(batch, 1), 8)            # sublane alignment
    block_b = min(b_pad, block_rows)
    b_pad = _round_up(b_pad, block_b)

    # Uniform, bias-free draw of the action indices (host/JAX side, exactly
    # like the np.random.randint call in the PyTorch module).
    r = jax.random.randint(key, (b_pad, 1), 0, action_space, dtype=jnp.int32)

    out = pl.pallas_call(
        random_policy_kernel,
        out_shape=jax.ShapeDtypeStruct((b_pad, a_pad), jnp.float32),
        grid=(b_pad // block_b,),
        in_specs=[pl.BlockSpec((block_b, 1), lambda i: (i, 0))],
        out_specs=pl.BlockSpec((block_b, a_pad), lambda i: (i, 0)),
        compiler_params=pltpu.CompilerParams(
            dimension_semantics=("parallel",)),
    )(r)
    return out[:batch, :action_space]


def random_policy_forward(seq, key, action_space):
    """Pallas equivalent of RandomPolicy.forward(seq): one (A,) one-hot draw.

    `seq` is accepted for API parity with the PyTorch module but is never
    read — and never DMA'd — because the policy is purely random.
    Pass a fresh `key` per step for a fresh random action per forward.
    """
    del seq  # unused by RandomPolicy.forward; it never enters the kernel.
    return random_policy_sample(key, action_space, batch=1)[0]


if __name__ == "__main__":
    ACTION_SPACE = 4   # stands in for env.action_space.n
    SEQ, HIDDEN = 8, 32

    root = jax.random.PRNGKey(0)
    k_seq, k_act, k_batch = jax.random.split(root, 3)
    seq = jax.random.normal(k_seq, (SEQ, HIDDEN), dtype=jnp.float32)

    # Single-step forward (matches the nn.Module call semantics).
    one_hot = jax.block_until_ready(
        random_policy_forward(seq, k_act, ACTION_SPACE))
    assert one_hot.shape == (ACTION_SPACE,)
    assert one_hot.dtype == jnp.float32
    assert float(jnp.sum(one_hot)) == 1.0
    assert float(jnp.max(one_hot)) == 1.0
    assert float(jnp.min(one_hot)) == 0.0

    # Batched sampling (preferred usage in an RL rollout: one call, many draws).
    B = 8
    actions = jax.block_until_ready(
        random_policy_sample(k_batch, ACTION_SPACE, batch=B))
    assert actions.shape == (B, ACTION_SPACE)
    assert actions.dtype == jnp.float32
    assert bool(jnp.all(jnp.sum(actions, axis=-1) == 1.0))
    assert bool(jnp.all(jnp.max(actions, axis=-1) == 1.0))
    assert bool(jnp.all(jnp.min(actions, axis=-1) == 0.0))

    print("KERNEL_OK")
</pallas_src>

<mosaic_0001>
module attributes {stable_mosaic.version = 11 : i64} {
  func.func @random_policy_kernel(%arg0: i32, %arg1: memref<8x1xi32, #tpu.memory_space<vmem>>, %arg2: memref<8x128xf32, #tpu.memory_space<vmem>>) attributes {dimension_semantics = [#tpu.dimension_semantics<parallel>], iteration_bounds = array<i64: 1>, scalar_prefetch = 0 : i64, scratch_operands = 0 : i64, tpu.core_type = #tpu.core_type<tc>, window_params = [{transform_indices = @transform_0, window_bounds = array<i64: 8, 1>}, {transform_indices = @transform_1, window_bounds = array<i64: 8, 128>}]} {
    %0 = tpu.iota {dimensions = array<i32: 1>} : vector<8x128xi32>
    %c0 = arith.constant 0 : index
    %c0_0 = arith.constant 0 : index
    %1 = vector.load %arg1[%c0, %c0_0] : memref<8x1xi32, #tpu.memory_space<vmem>>, vector<8x1xi32>
    %2 = vector.broadcast %1 : vector<8x1xi32> to vector<8x128xi32>
    %3 = arith.cmpi eq, %0, %2 : vector<8x128xi32>
    %4 = arith.extui %3 : vector<8x128xi1> to vector<8x128xi32>
    %5 = arith.sitofp %4 : vector<8x128xi32> to vector<8x128xf32>
    %c0_1 = arith.constant 0 : index
    %c0_2 = arith.constant 0 : index
    %6 = vector.load %arg2[%c0_1, %c0_2] : memref<8x128xf32, #tpu.memory_space<vmem>>, vector<8x128xf32>
    tpu.vector_store %arg2[%c0_1, %c0_2], %5 {strides = array<i32>} : memref<8x128xf32, #tpu.memory_space<vmem>>, vector<8x128xf32>,
    return
  }
  func.func @transform_0(%arg0: i32) -> (i32, i32) {
    %c0_i32 = arith.constant 0 : i32
    %c0_i32_0 = arith.constant 0 : i32
    return %arg0, %c0_i32 : i32, i32
  }
  func.func @transform_1(%arg0: i32) -> (i32, i32) {
    %c0_i32 = arith.constant 0 : i32
    %c0_i32_0 = arith.constant 0 : i32
    return %arg0, %c0_i32 : i32, i32
  }
}

</mosaic_0001>

<bundles_post_ra>
// kernel: tpu_custom_call.1
= control target key start
LH: loop header
LB: loop body
LE: loop exit
PB: predicated region body
PF: predicated region fallthrough
CT: control target
= control target key end

     0   :  { %s79_s0 = inlined_call_operand.vmem [shape: s32[8,1], index: 0, kind: input, shape index: {}]   ;;  %s80_s1 = inlined_call_operand.hbm [shape: f32[8,128], index: 1, kind: output, shape index: {}]  }
   0x1   :  { %v11_v0 = vld [vmem:[%s79_s0] sm:$0xff] }
   0x2   :  { %6 = vsyncpa [#allocation3], 0  ;;  %v60_v1 = vmov 0   ;;  %v9_v2 = vlaneseq  ;;  %s61_s8 = smov [#allocation2]   ;;  %v62_v5 = vmov 0.0  }
   0x3   :  { %37 = vset.pattern.permute.xlu0 %v60_v1  ;;  %s25_s9 = sshll.u32 %s61_s8, 4  ;;  %s26_s9 = int_to_ptr.vmem [resolvable:$true] %s25_s9 }
   0x4   :  { %13 = vperm.xlu0 %37, %v11_v0   ;;  %v10_v3 = vand.u32 127, %v9_v2  ;;  %s38_s10 = scalar_lea.vmem %s26_s9, 128  ;;  %p43_p1 = scmp.lt.s32.totalorder %s26_s9, %s26_s9 }
   0x5   :  { %p39_p0 = scmp.ne.s32.totalorder %s26_s9, %s38_s10  ;;  %p44_p2 = scmp.lt.s32.totalorder %s38_s10, %s38_s10 }
   0x7   :  { %p45_p3 = por %p44_p2, %p43_p1 }
   0x9   :  { %p46_p4 = pnand %p45_p3, %p39_p0 }
  0x7f   :  { %v14_v4 = vpop.permute.xlu0 %13 }
  0x80   :  { %vm15_vm0 = vcmp.eq.s32.totalorder %v10_v3, %v14_v4 }
  0x81   :  { %v33_v6 = vsel %vm15_vm0, 1.0, %v62_v5 }
  0x82   :  { %18 = vst [vmem:[#allocation2] sm:$0xff] %v33_v6 }
  0x83   :  { %49 = shalt.err (!%p46_p4)
}
  0x84   :  { %28 = dma.vmem_to_hbm [thread:$0]  %s26_s9, 128, %s80_s1, [#allocation3]  }
  0x85   :  { %58 = dma.done.wait [#allocation3], 128  }
  0x86   :  { %59 = vsyncadd [#allocation3], 4294967168 }
  0x87   :  { %32 = vsyncpa [#allocation3], 1 }

</bundles_post_ra>
